<compile_context>
chip_gen: v5e
topology: v5e:2x2
jax: 0.10.0
libtpu: 0.0.40
codegen_flags: <defaults>
</compile_context>

<pallas_src>
import random

import jax
import jax.numpy as jnp
from jax import lax
from jax.experimental import pallas as pl
from jax.experimental.pallas import tpu as pltpu


# ------------------------------- Pallas kernel -------------------------------

def _make_kernel(nc):
    def kernel(x_ref, mask_ref, wc_ref, bc_ref, wh_ref, bh_ref,
               cas_ref, att_ref, clf_ref, bg_ref):
        p = pl.program_id(0)                       # 0 = original pass, 1 = augmented
        x = x_ref[...]                             # (C_in, T) bf16, time on lanes
        T = x.shape[1]

        # Stride-12 augmentation: multiply by the tiny (1, T) 0/1 mask on the aug
        # pass only (replaces materializing a zeroed copy of x in HBM).
        x = jnp.where(p == 1, x * mask_ref[...], x)

        # Conv1d(k=3, padding=1) as 3 shifted matmuls on the VMEM tile
        # (in-kernel unfold: no padded / unfolded copies of x ever hit HBM).
        zcol = jnp.zeros((x.shape[0], 1), x.dtype)
        x_prev = jnp.concatenate([zcol, x[:, :T - 1]], axis=1)    # x[:, t-1]
        x_next = jnp.concatenate([x[:, 1:], zcol], axis=1)        # x[:, t+1]

        acc = jnp.dot(wc_ref[0], x_prev, preferred_element_type=jnp.float32)
        acc = acc + jnp.dot(wc_ref[1], x, preferred_element_type=jnp.float32)
        acc = acc + jnp.dot(wc_ref[2], x_next, preferred_element_type=jnp.float32)
        emb = jnp.maximum(acc + bc_ref[...], 0.0)                 # (2*Cout, T) f32

        # Fused heads of both branches (block-diagonal weight); the cls average is
        # folded into wh.  Rows: [0.5*(cls_rgb+cls_flow) (Nc), att_rgb, att_flow].
        head = jnp.dot(wh_ref[...], emb.astype(jnp.bfloat16),
                       preferred_element_type=jnp.float32) + bh_ref[...]
        cas = head[:nc, :]                                        # (Nc, T)
        att = 0.5 * (jax.nn.sigmoid(head[nc:nc + 1, :])
                     + jax.nn.sigmoid(head[nc + 1:nc + 2, :]))    # (1, T)

        cas_ref[...] = cas                                        # lane-dense stores
        att_ref[...] = att

        # Fused clf / bg temporal reductions (whole T resident in this block).
        att_sum = jnp.sum(att, axis=1, keepdims=True)             # (1, 1)
        one_m = 1.0 - att
        clf_ref[...] = (jnp.sum(cas * att, axis=1, keepdims=True)
                        / (att_sum + 1.0))                        # (Nc, 1)
        bg_ref[...] = (jnp.sum(cas * one_m, axis=1, keepdims=True)
                       / (jnp.sum(one_m, axis=1, keepdims=True) + 1e-6))

    return kernel


# --------------------------------- wrapper ------------------------------------

def self_network_forward(x, params, aug_offset):
    """SelfNetwork.forward. x: (B, C_in, T) float32 (PyTorch NCL layout).

    Returns (out_ori, out_aug), each {'cas','att','clf','bg'}.
    """
    B, c_in, T = x.shape
    wc, bc, wh, bh = params["wc"], params["bc"], params["wh"], params["bh"]
    nc = wh.shape[0] - 2

    # Input stays in NCL layout (time on lanes); bf16 halves the dominant HBM stream.
    x_bf = x.astype(jnp.bfloat16)
    # Tiny (1, T) mask for the stride-12 augmentation (aug_offset in [0, 11]).
    tmask = (jnp.arange(T, dtype=jnp.int32) % 12 != aug_offset)
    tmask = tmask.astype(jnp.bfloat16).reshape(1, T)

    cas_t, att_t, clf, bg = pl.pallas_call(
        _make_kernel(nc),
        grid=(2, B),                                   # (pass: ori/aug, batch)
        in_specs=[
            pl.BlockSpec((None, c_in, T), lambda p, b: (b, 0, 0)),   # x
            pl.BlockSpec((1, T), lambda p, b: (0, 0)),               # aug mask
            pl.BlockSpec(wc.shape, lambda p, b: (0, 0, 0)),          # conv taps
            pl.BlockSpec(bc.shape, lambda p, b: (0, 0)),
            pl.BlockSpec(wh.shape, lambda p, b: (0, 0)),             # head weight
            pl.BlockSpec(bh.shape, lambda p, b: (0, 0)),
        ],
        out_specs=[
            pl.BlockSpec((None, None, nc, T), lambda p, b: (p, b, 0, 0)),  # cas^T
            pl.BlockSpec((None, None, 1, T), lambda p, b: (p, b, 0, 0)),   # att^T
            pl.BlockSpec((None, None, nc, 1), lambda p, b: (p, b, 0, 0)),  # clf
            pl.BlockSpec((None, None, nc, 1), lambda p, b: (p, b, 0, 0)),  # bg
        ],
        out_shape=(
            jax.ShapeDtypeStruct((2, B, nc, T), jnp.float32),
            jax.ShapeDtypeStruct((2, B, 1, T), jnp.float32),
            jax.ShapeDtypeStruct((2, B, nc, 1), jnp.float32),
            jax.ShapeDtypeStruct((2, B, nc, 1), jnp.float32),
        ),
        compiler_params=pltpu.CompilerParams(
            dimension_semantics=("parallel", "parallel")),
    )(x_bf, tmask, wc, bc, wh, bh)

    cas = jnp.transpose(cas_t, (0, 1, 3, 2))           # (2, B, T, Nc)
    att = jnp.transpose(att_t, (0, 1, 3, 2))           # (2, B, T, 1)
    clf = clf[..., 0]                                  # (2, B, Nc)
    bg = bg[..., 0]                                    # (2, B, Nc)

    def pick(i):
        return {"cas": cas[i], "att": att[i], "clf": clf[i], "bg": bg[i]}

    return pick(0), pick(1)


def pack_params(tparams, in_features, class_num):
    """PyTorch-layout params -> fused block-diagonal kernel params.

    wc: (K, 2*Cout, C_in) bf16 — per-tap block-diagonal conv weight (output rows).
    bc: (2*Cout, 1) f32
    wh: (Nc+2, 2*Cout) bf16 — rows [0.5*(cls_rgb;cls_flow) (Nc), att_rgb, att_flow].
    bh: (Nc+2, 1) f32
    """
    (wc_r, bc_r, wcls_r, bcls_r, watt_r, batt_r) = tparams["rgb"]
    (wc_f, bc_f, wcls_f, bcls_f, watt_f, batt_f) = tparams["flow"]
    cout, c, K = wc_r.shape
    nc = class_num
    cin = in_features                                  # = 2 * c

    wc = jnp.zeros((K, 2 * cout, cin), jnp.float32)
    wc = wc.at[:, :cout, :c].set(jnp.transpose(wc_r, (2, 0, 1)))
    wc = wc.at[:, cout:, c:].set(jnp.transpose(wc_f, (2, 0, 1)))
    bc = jnp.concatenate([bc_r, bc_f]).reshape(2 * cout, 1)

    wh = jnp.zeros((nc + 2, 2 * cout), jnp.float32)
    wh = wh.at[:nc, :cout].set(0.5 * wcls_r)           # cls average folded in
    wh = wh.at[:nc, cout:].set(0.5 * wcls_f)
    wh = wh.at[nc, :cout].set(watt_r[0])
    wh = wh.at[nc + 1, cout:].set(watt_f[0])
    bh = jnp.zeros((nc + 2, 1), jnp.float32)
    bh = bh.at[:nc, 0].set(0.5 * (bcls_r + bcls_f))
    bh = bh.at[nc, 0].set(batt_r[0])
    bh = bh.at[nc + 1, 0].set(batt_f[0])

    return {"wc": wc.astype(jnp.bfloat16), "bc": bc,
            "wh": wh.astype(jnp.bfloat16), "bh": bh}


# --------------------------- pure-JAX reference -------------------------------

def fusion_reference(x, tparams):
    """Reference using PyTorch-layout parameters and lax conv (NCL), f32."""
    C = x.shape[1] // 2

    def backbone(xb, Wc, bc, Wcls, bcls, Watt, batt):
        emb = lax.conv_general_dilated(
            xb, Wc, window_strides=(1,), padding=[(1, 1)],
            dimension_numbers=("NCH", "OIH", "NCH"))
        emb = jnp.maximum(emb + bc[None, :, None], 0.0)        # (B, Cout, T)
        et = jnp.transpose(emb, (0, 2, 1))                     # (B, T, Cout)
        cas = et @ Wcls.T + bcls
        att = jax.nn.sigmoid(et @ Watt.T + batt)
        return cas, att

    cas1, att1 = backbone(x[:, :C, :], *tparams["rgb"])
    cas2, att2 = backbone(x[:, C:, :], *tparams["flow"])
    cas = (cas1 + cas2) / 2
    att = (att1 + att2) / 2
    clf = (cas * att).sum(axis=1) / (att.sum(axis=1) + 1)
    bg = (cas * (1 - att)).sum(axis=1) / ((1 - att).sum(axis=1) + 1e-6)
    return {"cas": cas, "att": att, "clf": clf, "bg": bg}


# ----------------------------------- main --------------------------------------

if __name__ == "__main__":
    # Small shapes consistent with the module.
    B, in_features, T = 2, 8, 16
    class_num = 8
    layer_params = [(32, 3)]          # (conv out channels, conv kernel size)
    Cout, K = layer_params[-1]
    C = in_features // 2              # per-branch features

    key = jax.random.PRNGKey(0)
    ks = jax.random.split(key, 13)
    u = lambda k, shp: jax.random.uniform(k, shp, jnp.float32, -0.1, 0.1)

    # PyTorch-layout parameters (deterministic synthetic init).
    tparams = {
        "rgb": (u(ks[0], (Cout, C, K)), u(ks[1], (Cout,)),
                u(ks[2], (class_num, Cout)), u(ks[3], (class_num,)),
                u(ks[4], (1, Cout)), u(ks[5], (1,))),
        "flow": (u(ks[6], (Cout, C, K)), u(ks[7], (Cout,)),
                 u(ks[8], (class_num, Cout)), u(ks[9], (class_num,)),
                 u(ks[10], (1, Cout)), u(ks[11], (1,))),
    }
    params = pack_params(tparams, in_features, class_num)

    # Deterministic input and deterministic "random" augmentation offset.
    x = jax.random.normal(ks[12], (B, in_features, T), jnp.float32)
    random.seed(0)
    aug_offset = random.randint(0, 11)

    out_ori, out_aug = self_network_forward(x, params, aug_offset)
    jax.block_until_ready(out_ori)
    jax.block_until_ready(out_aug)

    # Correctness check against a pure-JAX f32 reference of the PyTorch math.
    # Tolerance loosened vs f32-only because the matmul operands are bf16.
    ref_ori = fusion_reference(x, tparams)
    ref_aug = fusion_reference(x.at[:, :, aug_offset::12].set(0.0), tparams)
    for got, ref in ((out_ori, ref_ori), (out_aug, ref_aug)):
        for k in ("cas", "att", "clf", "bg"):
            assert got[k].shape == ref[k].shape, (k, got[k].shape, ref[k].shape)
            assert jnp.allclose(got[k], ref[k], rtol=2e-2, atol=2e-2), k

    print("KERNEL_OK")
</pallas_src>

<mosaic_0001>
module attributes {stable_mosaic.version = 11 : i64} {
  func.func @kernel(%arg0: i32, %arg1: i32, %arg2: memref<1x8x16xbf16, #tpu.memory_space<vmem>>, %arg3: memref<1x16xbf16, #tpu.memory_space<vmem>>, %arg4: memref<3x64x8xbf16, #tpu.memory_space<vmem>>, %arg5: memref<64x1xf32, #tpu.memory_space<vmem>>, %arg6: memref<10x64xbf16, #tpu.memory_space<vmem>>, %arg7: memref<10x1xf32, #tpu.memory_space<vmem>>, %arg8: memref<1x1x8x16xf32, #tpu.memory_space<vmem>>, %arg9: memref<1x1x1x16xf32, #tpu.memory_space<vmem>>, %arg10: memref<1x1x8x1xf32, #tpu.memory_space<vmem>>, %arg11: memref<1x1x8x1xf32, #tpu.memory_space<vmem>>) attributes {dimension_semantics = [#tpu.dimension_semantics<parallel>, #tpu.dimension_semantics<parallel>], iteration_bounds = array<i64: 2, 2>, scalar_prefetch = 0 : i64, scratch_operands = 0 : i64, tpu.core_type = #tpu.core_type<tc>, window_params = [{transform_indices = @transform_0, window_bounds = array<i64: 1, 8, 16>}, {pipeline_mode = #tpu.pipeline_mode<synchronous>, transform_indices = @transform_1, window_bounds = array<i64: 1, 16>}, {pipeline_mode = #tpu.pipeline_mode<synchronous>, transform_indices = @transform_2, window_bounds = array<i64: 3, 64, 8>}, {pipeline_mode = #tpu.pipeline_mode<synchronous>, transform_indices = @transform_3, window_bounds = array<i64: 64, 1>}, {pipeline_mode = #tpu.pipeline_mode<synchronous>, transform_indices = @transform_4, window_bounds = array<i64: 10, 64>}, {pipeline_mode = #tpu.pipeline_mode<synchronous>, transform_indices = @transform_5, window_bounds = array<i64: 10, 1>}, {transform_indices = @transform_6, window_bounds = array<i64: 1, 1, 8, 16>}, {transform_indices = @transform_7, window_bounds = array<i64: 1, 1, 1, 16>}, {transform_indices = @transform_8, window_bounds = array<i64: 1, 1, 8, 1>}, {transform_indices = @transform_9, window_bounds = array<i64: 1, 1, 8, 1>}]} {
    %c0 = arith.constant 0 : index
    %c0_0 = arith.constant 0 : index
    %c0_1 = arith.constant 0 : index
    %0 = vector.load %arg2[%c0, %c0_0, %c0_1] : memref<1x8x16xbf16, #tpu.memory_space<vmem>>, vector<1x8x16xbf16>
    %1 = vector.shape_cast %0 : vector<1x8x16xbf16> to vector<8x16xbf16>
    %c1_i32 = arith.constant 1 : i32
    %2 = arith.cmpi eq, %arg0, %c1_i32 : i32
    %c0_2 = arith.constant 0 : index
    %c0_3 = arith.constant 0 : index
    %3 = vector.load %arg3[%c0_2, %c0_3] : memref<1x16xbf16, #tpu.memory_space<vmem>>, vector<1x16xbf16>
    %4 = vector.broadcast %3 : vector<1x16xbf16> to vector<8x16xbf16>
    %5 = arith.mulf %1, %4 : vector<8x16xbf16>
    %6 = arith.select %2, %5, %1 : vector<8x16xbf16>
    %cst = arith.constant 0.000000e+00 : bf16
    %7 = vector.broadcast %cst : bf16 to vector<8x1xbf16>
    %8 = vector.extract_strided_slice %6 {offsets = [0, 0], sizes = [8, 15], strides = [1, 1]} : vector<8x16xbf16> to vector<8x15xbf16>
    %9 = tpu.concatenate %7, %8 in 1 : vector<8x1xbf16>, vector<8x15xbf16> -> vector<8x16xbf16>
    %10 = vector.extract_strided_slice %6 {offsets = [0, 1], sizes = [8, 15], strides = [1, 1]} : vector<8x16xbf16> to vector<8x15xbf16>
    %11 = tpu.concatenate %10, %7 in 1 : vector<8x15xbf16>, vector<8x1xbf16> -> vector<8x16xbf16>
    %c0_4 = arith.constant 0 : index
    %c0_5 = arith.constant 0 : index
    %c0_6 = arith.constant 0 : index
    %12 = vector.load %arg4[%c0_4, %c0_5, %c0_6] : memref<3x64x8xbf16, #tpu.memory_space<vmem>>, vector<1x64x8xbf16>
    %13 = vector.shape_cast %12 : vector<1x64x8xbf16> to vector<64x8xbf16>
    %cst_7 = arith.constant dense<0.000000e+00> : vector<64x16xf32>
    %14 = tpu.matmul %13, %9, %cst_7 {dimension_numbers = #tpu.dot_dimension_numbers<[1], [0], [0], [1], [0, 0, 1, 1], [], []>} : vector<64x8xbf16>, vector<8x16xbf16>, vector<64x16xf32> -> vector<64x16xf32>
    %c1 = arith.constant 1 : index
    %c0_8 = arith.constant 0 : index
    %c0_9 = arith.constant 0 : index
    %15 = vector.load %arg4[%c1, %c0_8, %c0_9] : memref<3x64x8xbf16, #tpu.memory_space<vmem>>, vector<1x64x8xbf16>
    %16 = vector.shape_cast %15 : vector<1x64x8xbf16> to vector<64x8xbf16>
    %cst_10 = arith.constant dense<0.000000e+00> : vector<64x16xf32>
    %17 = tpu.matmul %16, %6, %cst_10 {dimension_numbers = #tpu.dot_dimension_numbers<[1], [0], [0], [1], [0, 0, 1, 1], [], []>} : vector<64x8xbf16>, vector<8x16xbf16>, vector<64x16xf32> -> vector<64x16xf32>
    %18 = arith.addf %14, %17 : vector<64x16xf32>
    %c2 = arith.constant 2 : index
    %c0_11 = arith.constant 0 : index
    %c0_12 = arith.constant 0 : index
    %19 = vector.load %arg4[%c2, %c0_11, %c0_12] : memref<3x64x8xbf16, #tpu.memory_space<vmem>>, vector<1x64x8xbf16>
    %20 = vector.shape_cast %19 : vector<1x64x8xbf16> to vector<64x8xbf16>
    %cst_13 = arith.constant dense<0.000000e+00> : vector<64x16xf32>
    %21 = tpu.matmul %20, %11, %cst_13 {dimension_numbers = #tpu.dot_dimension_numbers<[1], [0], [0], [1], [0, 0, 1, 1], [], []>} : vector<64x8xbf16>, vector<8x16xbf16>, vector<64x16xf32> -> vector<64x16xf32>
    %22 = arith.addf %18, %21 : vector<64x16xf32>
    %c0_14 = arith.constant 0 : index
    %c0_15 = arith.constant 0 : index
    %23 = vector.load %arg5[%c0_14, %c0_15] : memref<64x1xf32, #tpu.memory_space<vmem>>, vector<64x1xf32>
    %24 = vector.broadcast %23 : vector<64x1xf32> to vector<64x16xf32>
    %25 = arith.addf %22, %24 : vector<64x16xf32>
    %cst_16 = arith.constant 0.000000e+00 : f32
    %26 = vector.broadcast %cst_16 : f32 to vector<64x16xf32>
    %27 = arith.maximumf %25, %26 : vector<64x16xf32>
    %c0_17 = arith.constant 0 : index
    %c0_18 = arith.constant 0 : index
    %28 = vector.load %arg6[%c0_17, %c0_18] : memref<10x64xbf16, #tpu.memory_space<vmem>>, vector<10x64xbf16>
    %29 = arith.truncf %27 : vector<64x16xf32> to vector<64x16xbf16>
    %cst_19 = arith.constant dense<0.000000e+00> : vector<10x16xf32>
    %30 = tpu.matmul %28, %29, %cst_19 {dimension_numbers = #tpu.dot_dimension_numbers<[1], [0], [0], [1], [0, 0, 1, 1], [], []>} : vector<10x64xbf16>, vector<64x16xbf16>, vector<10x16xf32> -> vector<10x16xf32>
    %c0_20 = arith.constant 0 : index
    %c0_21 = arith.constant 0 : index
    %31 = vector.load %arg7[%c0_20, %c0_21] : memref<10x1xf32, #tpu.memory_space<vmem>>, vector<10x1xf32>
    %32 = vector.broadcast %31 : vector<10x1xf32> to vector<10x16xf32>
    %33 = arith.addf %30, %32 : vector<10x16xf32>
    %34 = vector.extract_strided_slice %33 {offsets = [0, 0], sizes = [8, 16], strides = [1, 1]} : vector<10x16xf32> to vector<8x16xf32>
    %35 = vector.extract_strided_slice %33 {offsets = [8, 0], sizes = [1, 16], strides = [1, 1]} : vector<10x16xf32> to vector<1x16xf32>
    %36 = arith.negf %35 : vector<1x16xf32>
    %37 = math.exp %36 : vector<1x16xf32>
    %cst_22 = arith.constant 1.000000e+00 : f32
    %38 = vector.broadcast %cst_22 : f32 to vector<1x16xf32>
    %39 = arith.addf %38, %37 : vector<1x16xf32>
    %40 = arith.divf %38, %39 : vector<1x16xf32>
    %41 = vector.extract_strided_slice %33 {offsets = [9, 0], sizes = [1, 16], strides = [1, 1]} : vector<10x16xf32> to vector<1x16xf32>
    %42 = arith.negf %41 : vector<1x16xf32>
    %43 = math.exp %42 : vector<1x16xf32>
    %cst_23 = arith.constant 1.000000e+00 : f32
    %44 = vector.broadcast %cst_23 : f32 to vector<1x16xf32>
    %45 = arith.addf %44, %43 : vector<1x16xf32>
    %46 = arith.divf %44, %45 : vector<1x16xf32>
    %47 = arith.addf %40, %46 : vector<1x16xf32>
    %cst_24 = arith.constant 5.000000e-01 : f32
    %48 = vector.broadcast %cst_24 : f32 to vector<1x16xf32>
    %49 = arith.mulf %48, %47 : vector<1x16xf32>
    %c0_25 = arith.constant 0 : index
    %c0_26 = arith.constant 0 : index
    %c0_27 = arith.constant 0 : index
    %c0_28 = arith.constant 0 : index
    %50 = vector.load %arg8[%c0_25, %c0_26, %c0_27, %c0_28] : memref<1x1x8x16xf32, #tpu.memory_space<vmem>>, vector<1x1x8x16xf32>
    %51 = vector.shape_cast %50 : vector<1x1x8x16xf32> to vector<8x16xf32>
    %52 = vector.shape_cast %34 : vector<8x16xf32> to vector<1x1x8x16xf32>
    tpu.vector_store %arg8[%c0_25, %c0_26, %c0_27, %c0_28], %52 {strides = array<i32>} : memref<1x1x8x16xf32, #tpu.memory_space<vmem>>, vector<1x1x8x16xf32>,
    %c0_29 = arith.constant 0 : index
    %c0_30 = arith.constant 0 : index
    %c0_31 = arith.constant 0 : index
    %c0_32 = arith.constant 0 : index
    %53 = vector.load %arg9[%c0_29, %c0_30, %c0_31, %c0_32] : memref<1x1x1x16xf32, #tpu.memory_space<vmem>>, vector<1x1x1x16xf32>
    %54 = vector.shape_cast %53 : vector<1x1x1x16xf32> to vector<1x16xf32>
    %55 = vector.shape_cast %49 : vector<1x16xf32> to vector<1x1x1x16xf32>
    tpu.vector_store %arg9[%c0_29, %c0_30, %c0_31, %c0_32], %55 {strides = array<i32>} : memref<1x1x1x16xf32, #tpu.memory_space<vmem>>, vector<1x1x1x16xf32>,
    %cst_33 = arith.constant dense<0.000000e+00> : vector<1xf32>
    %56 = vector.multi_reduction <add>, %49, %cst_33 [1] : vector<1x16xf32> to vector<1xf32>
    %57 = vector.shape_cast %56 : vector<1xf32> to vector<1x1xf32>
    %cst_34 = arith.constant 1.000000e+00 : f32
    %58 = vector.broadcast %cst_34 : f32 to vector<1x16xf32>
    %59 = arith.subf %58, %49 : vector<1x16xf32>
    %60 = vector.broadcast %49 : vector<1x16xf32> to vector<8x16xf32>
    %61 = arith.mulf %34, %60 : vector<8x16xf32>
    %cst_35 = arith.constant dense<0.000000e+00> : vector<8xf32>
    %62 = vector.multi_reduction <add>, %61, %cst_35 [1] : vector<8x16xf32> to vector<8xf32>
    %63 = vector.shape_cast %62 : vector<8xf32> to vector<8x1xf32>
    %cst_36 = arith.constant 1.000000e+00 : f32
    %64 = vector.broadcast %cst_36 : f32 to vector<1x1xf32>
    %65 = arith.addf %57, %64 : vector<1x1xf32>
    %66 = vector.broadcast %65 : vector<1x1xf32> to vector<8x1xf32>
    %67 = arith.divf %63, %66 : vector<8x1xf32>
    %c0_37 = arith.constant 0 : index
    %c0_38 = arith.constant 0 : index
    %c0_39 = arith.constant 0 : index
    %c0_40 = arith.constant 0 : index
    %68 = vector.load %arg10[%c0_37, %c0_38, %c0_39, %c0_40] : memref<1x1x8x1xf32, #tpu.memory_space<vmem>>, vector<1x1x8x1xf32>
    %69 = vector.shape_cast %68 : vector<1x1x8x1xf32> to vector<8x1xf32>
    %70 = vector.shape_cast %67 : vector<8x1xf32> to vector<1x1x8x1xf32>
    tpu.vector_store %arg10[%c0_37, %c0_38, %c0_39, %c0_40], %70 {strides = array<i32>} : memref<1x1x8x1xf32, #tpu.memory_space<vmem>>, vector<1x1x8x1xf32>,
    %71 = vector.broadcast %59 : vector<1x16xf32> to vector<8x16xf32>
    %72 = arith.mulf %34, %71 : vector<8x16xf32>
    %cst_41 = arith.constant dense<0.000000e+00> : vector<8xf32>
    %73 = vector.multi_reduction <add>, %72, %cst_41 [1] : vector<8x16xf32> to vector<8xf32>
    %74 = vector.shape_cast %73 : vector<8xf32> to vector<8x1xf32>
    %cst_42 = arith.constant dense<0.000000e+00> : vector<1xf32>
    %75 = vector.multi_reduction <add>, %59, %cst_42 [1] : vector<1x16xf32> to vector<1xf32>
    %76 = vector.shape_cast %75 : vector<1xf32> to vector<1x1xf32>
    %cst_43 = arith.constant 9.99999997E-7 : f32
    %77 = vector.broadcast %cst_43 : f32 to vector<1x1xf32>
    %78 = arith.addf %76, %77 : vector<1x1xf32>
    %79 = vector.broadcast %78 : vector<1x1xf32> to vector<8x1xf32>
    %80 = arith.divf %74, %79 : vector<8x1xf32>
    %c0_44 = arith.constant 0 : index
    %c0_45 = arith.constant 0 : index
    %c0_46 = arith.constant 0 : index
    %c0_47 = arith.constant 0 : index
    %81 = vector.load %arg11[%c0_44, %c0_45, %c0_46, %c0_47] : memref<1x1x8x1xf32, #tpu.memory_space<vmem>>, vector<1x1x8x1xf32>
    %82 = vector.shape_cast %81 : vector<1x1x8x1xf32> to vector<8x1xf32>
    %83 = vector.shape_cast %80 : vector<8x1xf32> to vector<1x1x8x1xf32>
    tpu.vector_store %arg11[%c0_44, %c0_45, %c0_46, %c0_47], %83 {strides = array<i32>} : memref<1x1x8x1xf32, #tpu.memory_space<vmem>>, vector<1x1x8x1xf32>,
    return
  }
  func.func @transform_0(%arg0: i32, %arg1: i32) -> (i32, i32, i32) {
    %c0_i32 = arith.constant 0 : i32
    %c0_i32_0 = arith.constant 0 : i32
    %c0_i32_1 = arith.constant 0 : i32
    return %arg1, %c0_i32, %c0_i32_0 : i32, i32, i32
  }
  func.func @transform_1(%arg0: i32, %arg1: i32) -> (i32, i32) {
    %c0_i32 = arith.constant 0 : i32
    %c0_i32_0 = arith.constant 0 : i32
    %c0_i32_1 = arith.constant 0 : i32
    return %c0_i32, %c0_i32_0 : i32, i32
  }
  func.func @transform_2(%arg0: i32, %arg1: i32) -> (i32, i32, i32) {
    %c0_i32 = arith.constant 0 : i32
    %c0_i32_0 = arith.constant 0 : i32
    %c0_i32_1 = arith.constant 0 : i32
    %c0_i32_2 = arith.constant 0 : i32
    return %c0_i32, %c0_i32_0, %c0_i32_1 : i32, i32, i32
  }
  func.func @transform_3(%arg0: i32, %arg1: i32) -> (i32, i32) {
    %c0_i32 = arith.constant 0 : i32
    %c0_i32_0 = arith.constant 0 : i32
    %c0_i32_1 = arith.constant 0 : i32
    return %c0_i32, %c0_i32_0 : i32, i32
  }
  func.func @transform_4(%arg0: i32, %arg1: i32) -> (i32, i32) {
    %c0_i32 = arith.constant 0 : i32
    %c0_i32_0 = arith.constant 0 : i32
    %c0_i32_1 = arith.constant 0 : i32
    return %c0_i32, %c0_i32_0 : i32, i32
  }
  func.func @transform_5(%arg0: i32, %arg1: i32) -> (i32, i32) {
    %c0_i32 = arith.constant 0 : i32
    %c0_i32_0 = arith.constant 0 : i32
    %c0_i32_1 = arith.constant 0 : i32
    return %c0_i32, %c0_i32_0 : i32, i32
  }
  func.func @transform_6(%arg0: i32, %arg1: i32) -> (i32, i32, i32, i32) {
    %c0_i32 = arith.constant 0 : i32
    %c0_i32_0 = arith.constant 0 : i32
    %c0_i32_1 = arith.constant 0 : i32
    return %arg0, %arg1, %c0_i32, %c0_i32_0 : i32, i32, i32, i32
  }
  func.func @transform_7(%arg0: i32, %arg1: i32) -> (i32, i32, i32, i32) {
    %c0_i32 = arith.constant 0 : i32
    %c0_i32_0 = arith.constant 0 : i32
    %c0_i32_1 = arith.constant 0 : i32
    return %arg0, %arg1, %c0_i32, %c0_i32_0 : i32, i32, i32, i32
  }
  func.func @transform_8(%arg0: i32, %arg1: i32) -> (i32, i32, i32, i32) {
    %c0_i32 = arith.constant 0 : i32
    %c0_i32_0 = arith.constant 0 : i32
    %c0_i32_1 = arith.constant 0 : i32
    return %arg0, %arg1, %c0_i32, %c0_i32_0 : i32, i32, i32, i32
  }
  func.func @transform_9(%arg0: i32, %arg1: i32) -> (i32, i32, i32, i32) {
    %c0_i32 = arith.constant 0 : i32
    %c0_i32_0 = arith.constant 0 : i32
    %c0_i32_1 = arith.constant 0 : i32
    return %arg0, %arg1, %c0_i32, %c0_i32_0 : i32, i32, i32, i32
  }
}

</mosaic_0001>

<bundles_post_ra>
// kernel: tpu_custom_call.1
= control target key start
LH: loop header
LB: loop body
LE: loop exit
PB: predicated region body
PF: predicated region fallthrough
CT: control target
= control target key end

     0   :  { %s1708_s0 = inlined_call_operand.vmem [shape: bf16[2,8,16], index: 0, kind: input, shape index: {}]   ;;  %s1709_s1 = inlined_call_operand.vmem [shape: bf16[1,16], index: 1, kind: input, shape index: {}]   ;;  %s1710_s2 = inlined_call_operand.vmem [shape: bf16[3,64,8], index: 2, kind: input, shape index: {}]   ;;  %s1711_s3 = inlined_call_operand.vmem [shape: f32[64,1], index: 3, kind: input, shape index: {}]   ;;  %s1712_s4 = inlined_call_operand.vmem [shape: bf16[10,64], index: 4, kind: input, shape index: {}]   ;;  %s1713_s5 = inlined_call_operand.vmem [shape: f32[10,1], index: 5, kind: input, shape index: {}]   ;;  %s1714_s6 = inlined_call_operand.hbm [shape: f32[2,2,8,16], index: 6, kind: output, shape index: {0}]   ;;  %s1715_s7 = inlined_call_operand.hbm [shape: f32[2,2,1,16], index: 7, kind: output, shape index: {1}]   ;;  %s1716_s8 = inlined_call_operand.vmem [shape: f32[2,2,8,1], index: 8, kind: output, shape index: {2}]   ;;  %s1717_s9 = inlined_call_operand.vmem [shape: f32[2,2,8,1], index: 9, kind: output, shape index: {3}]  }
   0x1   :  { %1722 = sst [smem:[#allocation11_spill]] %s1708_s0 }
   0x2   :  { %1723 = sst [smem:[#allocation12_spill]] %s1709_s1 }
   0x3   :  { %1724 = sst [smem:[#allocation13_spill]] %s1710_s2 }
   0x4   :  { %1725 = sst [smem:[#allocation14_spill]] %s1711_s3 }
   0x5   :  { %1726 = sst [smem:[#allocation15_spill]] %s1712_s4 }
   0x6   :  { %1727 = sst [smem:[#allocation16_spill]] %s1713_s5 }
   0x7   :  { %15 = vsyncpa [#allocation3], 0 }
   0x8   :  { %17 = vsyncpa [#allocation3 + $0x1], 0 }
   0x9   :  { %18 = vsyncpa [#allocation5], 0 }
   0xa   :  { %20 = vsyncpa [#allocation5 + $0x1], 0  ;;  %s1452_s30 = smov 0   ;;  %s1454_s10 = smov 0  }
   0xb   :  { %s1456_s11 = smov 0   ;;  %s1458_s12 = smov 0  }
   0xc   :  { %s1460_s13 = smov 0   ;;  %s1462_s14 = smov 0  }
   0xd   :  { %s1464_s15 = smov 0   ;;  %s1466_s16 = smov 0  }
   0xe LB: > { %1728 = sst [smem:[#allocation8_spill]] %s1393_s15  ;;  %s1069_s17 = sadd.s32 4294967295, %s1397_s16   ;;  %s1397_s16 = sphi %s1466_s16, %s26_s16   ;;  %s1393_s15 = sphi %s1464_s15, %s1742_s15   ;;  %s1389_s14 = sphi %s1462_s14, %s1747_s14   ;;  %s1385_s13 = sphi %s1460_s13, %s1740_s13   ;;  %s1381_s12 = sphi %s1458_s12, %s1746_s12   ;;  %s1377_s11 = sphi %s1456_s11, %s1745_s11   ;;  %s1373_s10 = sphi %s1454_s10, %s1744_s10   ;;  %s1369_s30 = sphi %s1452_s30, %s1743_s30  }
   0xf   : > { %s1070_s18 = sadd.s32 4294967294, %s1397_s16   ;;  %s35_s19 = sadd.s32 1, %s1389_s14 }
  0x10   : > { %p36_p0 = scmp.ge.s32.totalorder %s35_s19, 2  ;;  %s38_s20 = sadd.s32 1, %s1393_s15 }
  0x11   : > { %p188_p1 = scmp.ne.s32.totalorder %s1377_s11, %s1373_s10  ;;  %p189_p2 = scmp.eq.s32.totalorder %s1069_s17, 3 }
  0x12   : > { %s1749_s19 = smov (%p36_p0, %s35_s19), 0  ;;  %s1751_s20 = smov (!%p36_p0, %s38_s20), %s1393_s15 }
  0x13   : > { %1729 = sst [smem:[#allocation9_spill]] %s1749_s19  ;;  %s174_s21 = ssub.s32 %s1389_s14, %s1749_s19 }
  0x14   : > { %p1503_p3 = por %p189_p2, %p188_p1  ;;  %p40_p4 = scmp.ge.s32.totalorder %s1751_s20, 2 }
  0x15   : > { %p194_p5 = scmp.ne.s32.totalorder %s1373_s10, %s1369_s30  ;;  %p195_p6 = scmp.eq.s32.totalorder %s1070_s18, 3 }
  0x16   : > { %p1073_p7 = scmp.ge.s32.totalorder %s1397_s16, 1  ;;  %s1753_s20 = smov (%p40_p4, %s1751_s20), 0 }
  0x17   : > { %1731 = sst [smem:[#allocation10_spill]] %s1753_s20  ;;  %p1512_p8 = por %p195_p6, %p194_p5 }
  0x18   : > { %p319_p9 = scmp.lt.s32.totalorder %s1397_s16, 5  ;;  %s173_s24 = ssub.s32 %s1393_s15, %s1753_s20 }
  0x19   : > { %s178_s25 = sadd.s32 1, %s1377_s11  ;;  %s175_s26 = sor.u32 %s174_s21, %s173_s24 }
  0x1a   : > { %p320_p10 = pnand %p1073_p7, %p319_p9  ;;  %p176_p11 = scmp.eq.s32.totalorder %s175_s26, 0 }
  0x1b   : > { %p374_p12 = scmp.lt.s32.totalorder (!%p320_p10), %s1381_s12, 1  ;;  %p396_p13 = scmp.eq.s32.totalorder (!%p320_p10), %s1385_s13, 1 }
  0x1c   : > { %s1521_s27 = scalar_select %p176_p11, %s1377_s11, %s178_s25  }
  0x1d   : > { %323 = sbr.rel (%p320_p10) target bundleno = 705 (0x2c1), region = 44  ;;  %s1733_s1 = sld [smem:[#allocation12_spill]] (!%p320_p10) }
  0x1e   : > { %s1734_s0 = sld [smem:[#allocation11_spill]] (!%p320_p10)  ;;  %s1399_s28 = smov (!%p320_p10), 127  }
  0x1f   : > { %s1400_s29 = smov (!%p320_p10), 1   ;;  %s1735_s2 = sld [smem:[#allocation13_spill]] (!%p320_p10) }
  0x20   : > { %s1736_s3 = sld [smem:[#allocation14_spill]] (!%p320_p10)  ;;  %s1624_s24 = sand.u32 (!%p320_p10), 1, %s1373_s10  }
  0x21   : > { %s1737_s5 = sld [smem:[#allocation16_spill]] (!%p320_p10)  ;;  %s1718_s25 = scalar_lea.vmem (!%p320_p10), [#allocation4], %s1624_s24 }
  0x22   : > { %s1529_s17 = scalar_select %p374_p12, %s1381_s12, 1  ;;  %vm474_vm1 = vcmask 1043456   ;;  %vm461_vm2 = vcmask 64512   ;;  %v1401_v15 = vmov 0   ;;  %vm421_vm3 = vcmask 121856  }
  0x23   : > { %v397_v0 = vld [vmem:[%s1733_s1] sm:$0x1]  ;;  %s406_s18 = scalar_select %p396_p13, 1, 0  ;;  %1260 = vset.pattern.permute.xlu1 %v1401_v15  ;;  %1261 = vset.pattern.permute.xlu2 %v1401_v15  ;;  %vm415_vm4 = vcmask 7168   ;;  %vm737_vm5 = vcmask 523264  }
  0x24   : > { %v399_v1 = vpack.i.b16 %v397_v0, %v397_v0  ;;  %s1075_s21 = sshll.u32 %s1529_s17, 2  ;;  %1262 = vset.pattern.permute.xlu0 %v1401_v15  ;;  %s1738_s4 = sld [smem:[#allocation15_spill]]  ;;  %vm779_vm6 = vcmask 130048   ;;  %vm781_vm11 = vcmask 122880  }
  0x25   : > { %s377_s26 = scalar_lea.vmem %s1734_s0, %s1075_s21  ;;  %v407_v6 = vstv %s406_s18  ;;  %v1172_v13 = vld [vmem:[%s1735_s2 + $0x20] sm:$0xff]  ;;  %v1173_v17 = vld [vmem:[%s1735_s2 + $0x28] sm:$0xff]  ;;  %v1174_v25 = vld [vmem:[%s1735_s2 + $0x30] sm:$0xff]  ;;  %s1074_s21 = sshll.u32 %s1624_s24, 3 }
  0x26   : > { %v401_v2 = vperm.slane %v399_v1, 0  ;;  %v395_v4 = vld [vmem:[%s377_s26] sm:$0xf]  ;;  %vm408_vm0 = vcmp.eq.s32.totalorder %v407_v6, 1  ;;  %v656_v14 = vld [vmem:[%s1736_s3 + $0x30] sm:$0xff]  ;;  %v657_v16 = vld [vmem:[%s1736_s3 + $0x38] sm:$0xff] }
  0x27   : > { %v402_v5 = vunpack.c.l.bf16 %v395_v4  ;;  %690 = vperm.xlu1 %1260, %v656_v14   ;;  %v653_v18 = vld [vmem:[%s1736_s3 + $0x18] sm:$0xff]  ;;  %v654_v19 = vld [vmem:[%s1736_s3 + $0x20] sm:$0xff]  ;;  %v651_v24 = vld [vmem:[%s1736_s3 + $0x8] sm:$0xff]  ;;  %s1627_s18 = scalar_lea.vmem [#allocation2], %s1074_s21  ;;  %s1163_s0 = sshll.u32 %s1385_s13, 1 }
  0x28   : > { %v403_v3 = vunpack.c.l.bf16 %v401_v2  ;;  %680 = vperm.xlu2 %1261, %v654_v19   ;;  %v1176_v23 = vld [vmem:[%s1735_s2 + $0x40] sm:$0xff]  ;;  %v655_v26 = vld [vmem:[%s1736_s3 + $0x28] sm:$0xff]  ;;  %v652_v27 = vld [vmem:[%s1736_s3 + $0x10] sm:$0xff]  ;;  %s867_s26 = sadd.s32 %s1381_s12, %s1163_s0  ;;  %s871_s1 = sshll.u32 %s1627_s18, 4  ;;  %s872_s1 = int_to_ptr.vmem [resolvable:$true] %s871_s1 }
  0x29   : > { %v1168_v31 = vld [vmem:[%s1735_s2] sm:$0xff]  ;;  %v1177_v33 = vld [vmem:[%s1735_s2 + $0x48] sm:$0xff]  ;;  %v1175_v34 = vld [vmem:[%s1735_s2 + $0x38] sm:$0xff]  ;;  %s1291_s0 = scalar_lea.hbm %s1714_s6, 32 }
  0x2a   : > { %v404_v7 = vmul.f32 %v403_v3, %v402_v5  ;;  %v650_v32 = vld [vmem:[%s1736_s3] sm:$0xff]  ;;  %v1169_v35 = vld [vmem:[%s1735_s2 + $0x8] sm:$0xff]  ;;  %v1178_v38 = vld [vmem:[%s1735_s2 + $0x50] sm:$0xff]  ;;  %s837_s3 = scalar_lea.sflag [#allocation3], %s1624_s24 }
  0x2b   : > { %v720_v36 = vld [vmem:[%s1737_s5] sm:$0xff]  ;;  %v721_v37 = vld [vmem:[%s1737_s5 + $0x8] sm:$0x3]  ;;  %v1170_v39 = vld [vmem:[%s1735_s2 + $0x10] sm:$0xff] }
  0x2c   : > { %v405_v8 = vpack.c.bf16 %v404_v7, %v404_v7  ;;  %v1179_v40 = vld [vmem:[%s1735_s2 + $0x58] sm:$0xff] }
  0x2d   : > { %v1171_v41 = vld [vmem:[%s1735_s2 + $0x18] sm:$0xff] }
  0x2e   : > { %v409_v9 = vsel %vm408_vm0, %v405_v8, %v395_v4 }
  0x2f   : > { %v411_v10 = vunpack.c.l.b16 %v409_v9  ;;  %v476_v12 = vsel %vm474_vm1, %v409_v9, 0  ;;  %695 = vperm.xlu1 %1260, %v657_v16  }
  0x30   : > { %485 = vmatpush.bf16.msra.mxu0 %v476_v12  ;;  %685 = vperm.xlu2 %1261, %v655_v26  }
  0x31   : > { %v412_v11 = vpack.c.b16 %v411_v10, %v411_v10 }
  0x33   : > { %419 = vrot.lane.b32.xlu0 %v412_v11, %s1399_s28  ;;  %1104 = vmatmul.msk.bf16.vlgmr.msra.gmra.mxu0 %vm461_vm2, %v1172_v13  ;;  %s1164_s28 = sshll.u32 %s867_s26, 3 }
  0x37   : > { %675 = vperm.xlu1 %1260, %v653_v18  }
  0x38   : > { %660 = vperm.xlu2 %1261, %v650_v32  }
  0x3b   : > { %413 = vrot.lane.b32.xlu0 %v412_v11, %s1400_s29 }
  0x3f   : > { %665 = vperm.xlu1 %1260, %v651_v24  }
  0x40   : > { %729 = vperm.xlu2 %1261, %v721_v37  }
  0x43   : > { %1105 = vmatmul.msk.bf16.gmra.mxu0 %vm461_vm2, %v1173_v17  ;;  %670 = vperm.xlu0 %1262, %v652_v27  }
  0x4b   : > { %724 = vperm.xlu0 %1262, %v720_v36  }
  0x53   : > { %1106 = vmatmul.msk.bf16.gmra.mxu0 %vm461_vm2, %v1174_v25 }
  0x63   : > { %1107 = vmatmul.msk.bf16.gmra.mxu0 %vm461_vm2, %v1175_v34 }
  0x82   : > { %v681_v1 = vpop.permute.xlu2 %680 }
  0x8a   : > { %v686_v14 = vpop.permute.xlu2 %685 }
  0x92   : > { %v661_v36 = vpop.permute.xlu2 %660 }
  0x99   : > { %v691_v59 = vpop.permute.xlu1 %690 }
  0xa1   : > { %v696_v63 = vpop.permute.xlu1 %695 }
  0xa5   : > { %v420_v20 = vpop.permute.xlu0 %419 }
  0xa6   : > { %v423_v21 = vsel %vm421_vm3, %v420_v20, 0 }
  0xa7   : > { %v611_v22 = vsel %vm474_vm1, %v423_v21, 0 }
  0xa8   : > { %620 = vmatpush.bf16.msra.mxu2 %v611_v22 }
  0xa9   : > { %v676_v6 = vpop.permute.xlu1 %675 }
  0xab   : > { %1152 = vmatmul.msk.bf16.vlgmr.msra.gmra.mxu2 %vm461_vm2, %v1176_v23 }
  0xad   : > { %v414_v28 = vpop.permute.xlu0 %413 }
  0xae   : > { %v418_v29 = vsel %vm415_vm4, 0, %v414_v28 }
  0xaf   : > { %v539_v30 = vsel %vm474_vm1, %v418_v29, 0 }
  0xb0   : > { %548 = vmatpush.bf16.msra.mxu1 %v539_v30  ;;  %v487_v42 = vpop.f32.mrf.mxu0 }
  0xb3   : > { %1124 = vmatmul.msk.bf16.vlgmr.msra.gmra.mxu1 %vm461_vm2, %v1168_v31 }
  0xb5   : > { %v671_v28 = vpop.permute.xlu0 %670 }
  0xb8   : > { %v489_v43 = vpop.f32.mrf.mxu0 }
  0xbb   : > { %1153 = vmatmul.msk.bf16.gmra.mxu2 %vm461_vm2, %v1177_v33  ;;  %v666_v33 = vpop.permute.xlu1 %665 }
  0xc0   : > { %v492_v49 = vpop.f32.mrf.mxu0 }
  0xc3   : > { %1125 = vmatmul.msk.bf16.gmra.mxu1 %vm461_vm2, %v1169_v35 }
  0xc8   : > { %v494_v52 = vpop.f32.mrf.mxu0 }
  0xcb   : > { %1154 = vmatmul.msk.bf16.gmra.mxu2 %vm461_vm2, %v1178_v38 }
  0xd0   : > { %v497_v56 = vpop.f32.mrf.mxu0 }
  0xd3   : > { %1126 = vmatmul.msk.bf16.gmra.mxu1 %vm461_vm2, %v1170_v39 }
  0xd8   : > { %v499_v60 = vpop.f32.mrf.mxu0 }
  0xdb   : > { %1155 = vmatmul.msk.bf16.gmra.mxu2 %vm461_vm2, %v1179_v40 }
  0xe0   : > { %v502_v0 = vpop.f32.mrf.mxu0 }
  0xe3   : > { %1127 = vmatmul.msk.bf16.gmra.mxu1 %vm461_vm2, %v1171_v41 }
  0xe8   : > { %v504_v9 = vpop.f32.mrf.mxu0 }
 0x12e   : > { %v622_v44 = vpop.f32.mrf.mxu2 }
 0x130   : > { %v550_v45 = vpop.f32.mrf.mxu1 }
 0x131   : > { %v551_v46 = vadd.f32 %v550_v45, %v487_v42  ;;  %v1158_v45 = vld [vmem:[%s1738_s4] sm:$0xf] }
 0x133   : > { %v642_v47 = vadd.f32 %v622_v44, %v551_v46  ;;  %v1180_v46 = vld [vmem:[%s1738_s4] sm:$0x10] }
 0x135   : > { %v698_v40 = vadd.f32 %v661_v36, %v642_v47  ;;  %v725_v47 = vpop.permute.xlu0 %724 }
 0x136   : > { %v624_v48 = vpop.f32.mrf.mxu2 }
 0x137   : > { %v706_v44 = vmax.f32 %v698_v40, 0.0 }
 0x138   : > { %v552_v50 = vpop.f32.mrf.mxu1 }
 0x139   : > { %v553_v20 = vadd.f32 %v552_v50, %v489_v43 }
 0x13b   : > { %v643_v29 = vadd.f32 %v624_v48, %v553_v20 }
 0x13d   : > { %v699_v37 = vadd.f32 %v666_v33, %v643_v29 }
 0x13e   : > { %v627_v51 = vpop.f32.mrf.mxu2 }
 0x13f   : > { %v707_v42 = vmax.f32 %v699_v37, 0.0 }
 0x140   : > { %v555_v53 = vpop.f32.mrf.mxu1 }
 0x141   : > { %v556_v16 = vadd.f32 %v555_v53, %v492_v49  ;;  %v716_v48 = vpack.c.bf16 %v707_v42, %v706_v44  ;;  %v1159_v49 = vor.u32 %v1180_v46, %v1158_v45 }
 0x143   : > { %v644_v24 = vadd.f32 %v627_v51, %v556_v16 }
 0x145   : > { %v700_v34 = vadd.f32 %v671_v28, %v644_v24 }
 0x146   : > { %v629_v54 = vpop.f32.mrf.mxu2 }
 0x147   : > { %v708_v41 = vmax.f32 %v700_v34, 0.0 }
 0x148   : > { %v557_v55 = vpop.f32.mrf.mxu1 }
 0x149   : > { %v558_v11 = vadd.f32 %v557_v55, %v494_v52  ;;  %v730_v52 = vpop.permute.xlu2 %729 }
 0x14b   : > { %v645_v21 = vadd.f32 %v629_v54, %v558_v11 }
 0x14d   : > { %v701_v32 = vadd.f32 %v676_v6, %v645_v21 }
 0x14e   : > { %v632_v57 = vpop.f32.mrf.mxu2 }
 0x14f   : > { %v709_v39 = vmax.f32 %v701_v32, 0.0 }
 0x150   : > { %v560_v58 = vpop.f32.mrf.mxu1 }
 0x151   : > { %v561_v7 = vadd.f32 %v560_v58, %v497_v56  ;;  %v717_v43 = vpack.c.bf16 %v709_v39, %v708_v41 }
 0x153   : > { %v646_v17 = vadd.f32 %v632_v57, %v561_v7 }
 0x155   : > { %v702_v27 = vadd.f32 %v681_v1, %v646_v17 }
 0x156   : > { %v634_v61 = vpop.f32.mrf.mxu2 }
 0x157   : > { %v710_v35 = vmax.f32 %v702_v27, 0.0 }
 0x158   : > { %v562_v62 = vpop.f32.mrf.mxu1 }
 0x159   : > { %v563_v5 = vadd.f32 %v562_v62, %v499_v60 }
 0x15b   : > { %v647_v12 = vadd.f32 %v634_v61, %v563_v5 }
 0x15d   : > { %v703_v23 = vadd.f32 %v686_v14, %v647_v12 }
 0x15e   : > { %v637_v2 = vpop.f32.mrf.mxu2 }
 0x15f   : > { %v711_v31 = vmax.f32 %v703_v23, 0.0 }
 0x160   : > { %v565_v3 = vpop.f32.mrf.mxu1 }
 0x161   : > { %v566_v4 = vadd.f32 %v565_v3, %v502_v0  ;;  %v718_v38 = vpack.c.bf16 %v711_v31, %v710_v35 }
 0x163   : > { %v648_v8 = vadd.f32 %v637_v2, %v566_v4 }
 0x165   : > { %v704_v19 = vadd.f32 %v691_v59, %v648_v8 }
 0x166   : > { %v639_v15 = vpop.f32.mrf.mxu2 }
 0x167   : > { %v712_v25 = vmax.f32 %v704_v19, 0.0 }
 0x168   : > { %v567_v10 = vpop.f32.mrf.mxu1 }
 0x169   : > { %v568_v13 = vadd.f32 %v567_v10, %v504_v9 }
 0x16b   : > { %v649_v18 = vadd.f32 %v639_v15, %v568_v13 }
 0x16d   : > { %v705_v22 = vadd.f32 %v696_v63, %v649_v18 }
 0x16f   : > { %v713_v26 = vmax.f32 %v705_v22, 0.0 }
 0x171   : > { %v719_v30 = vpack.c.bf16 %v713_v26, %v712_v25 }
 0x173   : > { %745 = vmatpush.bf16.msra.mxu3 %v719_v30 }
 0x177   : > { %746 = vmatpush.bf16.msra.mxu3 %v718_v38 }
 0x17b   : > { %747 = vmatpush.bf16.msra.mxu3 %v717_v43 }
 0x17f   : > { %748 = vmatpush.bf16.msra.mxu3 %v716_v48 }
 0x182   : > { %1160 = vmatmul.msk.bf16.vlgmr.msra.gmra.mxu3 %vm737_vm5, %v1159_v49 }
 0x205   : > { %v750_v50 = vpop.f32.mrf.mxu3 }
 0x206   : > { %v751_v51 = vadd.f32 %v750_v50, %v725_v47 }
 0x208   : > { %780 = vst.msk [vmem:[%s1627_s18] sm:$0xff] %vm779_vm6, %v751_v51 }
 0x20d   : > { %v752_v53 = vpop.f32.mrf.mxu3 }
 0x20e   : > { %v753_v54 = vadd.f32 %v752_v53, %v730_v52 }
 0x210   : > { %v1161_v55 = vmul.f32 -1.442695, %v753_v54 }
 0x212   : > { %1263 = vpow2.f32 %v1161_v55 }
 0x218   : > { %v1264_v56 = vpop.eup %1263 }
 0x219   : > { %v758_v57 = vadd.f32 1.0, %v1264_v56 }
 0x21b   : > { %1265 = vrcp.f32 %v758_v57  ;;  %v770_v61 = vand.u32 2147483648, %v758_v57  ;;  %v768_v63 = vand.u32 2147483647, %v758_v57  ;;  %vm764_vm8 = vweird.f32 %v758_v57 }
 0x21d   : > { %v771_v1 = vor.u32 1.1754944e-38, %v770_v61  ;;  %vm769_vm10 = vcmp.eq.f32.partialorder %v768_v63, 8.507059e+37 }
 0x221   : > { %v1266_v58 = vpop.eup %1265 }
 0x222   : > { %v760_v59 = vmul.f32 %v1266_v58, %v758_v57  ;;  %vm765_vm7 = vweird.f32 %v1266_v58 }
 0x223   : > { %vm766_vm9 = vmor %vm764_vm8, %vm765_vm7 }
 0x224   : > { %v761_v60 = vsub.f32 1.0, %v760_v59 }
 0x226   : > { %v762_v62 = vmul.f32 %v1266_v58, %v761_v60 }
 0x228   : > { %v763_v0 = vadd.f32 %v1266_v58, %v762_v62 }
 0x22a   : > { %v767_v2 = vsel %vm766_vm9, %v1266_v58, %v763_v0 }
 0x22b   : > { %v772_v3 = vsel %vm769_vm10, %v771_v1, %v767_v2 }
 0x22c   : > { %v775_v4 = vrot.slane %v772_v3, 1 }
 0x22e   : > { %v777_v5 = vadd.f32 %v775_v4, %v772_v3 }
 0x230   : > { %v778_v6 = vmul.f32 0.5, %v777_v5 }
 0x232   : > { %v783_v7 = vsel %vm781_vm11, %v778_v6, 0.0  ;;  %v786_v8 = vsub.f32 1.0, %v778_v6  ;;  %v787_v9 = vperm.slane %v778_v6, 0  ;;  %782 = vst.msk [vmem:[%s1718_s25] sm:$0x1] %vm781_vm11, %v778_v6  ;;  %s869_s25 = scalar_lea.hbm %s1714_s6, %s1164_s28 }
 0x233   : > { %784 = vadd.xlane.f32.xlu1 %v783_v7  ;;  %s873_s2 = sshll.u32 %s869_s25, 4  ;;  %s874_s2 = int_to_ptr.hbm [resolvable:$true] %s873_s2 }
 0x234   : > { %v815_v10 = vsel %vm781_vm11, %v786_v8, 0.0  ;;  %v788_v11 = vmul.f32 %v787_v9, %v751_v51  ;;  %v810_v12 = vperm.slane %v786_v8, 0  ;;  %s1285_s4 = sshra.s32 %s874_s2, 4  ;;  %s1286_s4 = int_to_ptr.hbm [resolvable:$true] %s1285_s4 }
 0x235   : > { %816 = vadd.xlane.f32.xlu2 %v815_v10  ;;  %s1287_s5 = scalar_lea.hbm %s1286_s4, 8  ;;  %p1292_p4 = scmp.lt.s32.totalorder %s1286_s4, %s1714_s6 }
 0x236   : > { %v789_v13 = vsel %vm779_vm6, %v788_v11, 0.0  ;;  %v811_v14 = vmul.f32 %v810_v12, %v751_v51  ;;  %p1288_p0 = scmp.ne.s32.totalorder %s1286_s4, %s1287_s5  ;;  %p1293_p5 = scmp.lt.s32.totalorder %s1291_s0, %s1287_s5 }
 0x237   : > { %790 = vadd.xlane.f32.xlu0 %v789_v13 }
 0x238   : > { %v812_v15 = vsel %vm779_vm6, %v811_v14, 0.0  ;;  %p1289_p1 = pnand %p1288_p0, %p1503_p3  ;;  %p1294_p6 = por %p1293_p5, %p1292_p4 }
 0x23a   : > { %p1290_p2 = pneg %p1289_p1 }
 0x23c   : > { %p1295_p7 = pnand %p1294_p6, %p1290_p2 }
 0x23d   : > { %813 = vadd.xlane.f32.xlu2 %v812_v15 }
 0x23e   : > { %1298 = shalt.err (!%p1295_p7)
}
 0x23f   : > { %1181 = dma.vmem_to_hbm [thread:$0]  (%p1503_p3), %s872_s1, 128, %s874_s2, %s837_s3  }
 0x240   : > { %s884_s28 = scalar_lea.hbm %s1715_s7, %s867_s26  ;;  %s1739_s20 = scalar_lea.vmem [#allocation4], %s1624_s24 }
 0x241   : > { %s886_s29 = sshll.u32 %s1739_s20, 4  ;;  %s888_s21 = sshll.u32 %s884_s28, 4  ;;  %s887_s29 = int_to_ptr.vmem [resolvable:$true] %s886_s29  ;;  %s889_s21 = int_to_ptr.hbm [resolvable:$true] %s888_s21 }
 0x242   : > { %s842_s4 = scalar_lea.sflag [#allocation5], %s1624_s24  ;;  %s1313_s5 = sshra.s32 %s889_s21, 4  ;;  %s1314_s5 = int_to_ptr.hbm [resolvable:$true] %s1313_s5 }
 0x243   : > { %s1315_s15 = scalar_lea.hbm %s1314_s5, 1  ;;  %s1319_s1 = scalar_lea.hbm %s1715_s7, 4 }
 0x244   : > { %p1316_p9 = scmp.ne.s32.totalorder %s1314_s5, %s1315_s15  ;;  %p1320_p12 = scmp.lt.s32.totalorder %s1314_s5, %s1715_s7 }
 0x245   : > { %p1321_p13 = scmp.lt.s32.totalorder %s1319_s1, %s1315_s15 }
 0x246   : > { %p1317_p10 = pnand %p1316_p9, %p1503_p3 }
 0x247   : > { %p1322_p0 = por %p1321_p13, %p1320_p12 }
 0x248   : > { %p1318_p11 = pneg %p1317_p10 }
 0x24a   : > { %p1323_p1 = pnand %p1322_p0, %p1318_p11 }
 0x24c   : > { %1326 = shalt.err (!%p1323_p1)
}
 0x24d   : > { %1182 = dma.vmem_to_hbm [thread:$0]  (%p1503_p3), %s887_s29, 16, %s889_s21, %s842_s4  }
 0x24e   : > { %p378_p2 = scmp.lt.s32.totalorder %s1385_s13, 1 }
 0x250   : > { %s1755_s13 = smov (!%p378_p2, %s1385_s13), 1 }
 0x251   : > { %s1076_s24 = sshll.u32 %s1755_s13, 1 }
 0x252   : > { %s383_s22 = sadd.s32 %s1076_s24, %s1529_s17 }
 0x253   : > { %s1077_s26 = sshll.u32 %s383_s22, 3 }
 0x254   : > { %s385_s0 = scalar_lea.vmem %s1716_s8, %s1077_s26  ;;  %s393_s28 = scalar_lea.vmem %s1717_s9, %s1077_s26 }
 0x2a6   : > { %v785_v16 = vpop.xlane.xlu1 %784 }
 0x2a7   : > { %v792_v17 = vadd.f32 1.0, %v785_v16 }
 0x2a8   : > { %v817_v18 = vpop.xlane.xlu2 %816 }
 0x2a9   : > { %v793_v19 = vperm.slane %v792_v17, 0  ;;  %v818_v20 = vadd.f32 1e-06, %v817_v18 }
 0x2aa   : > { %v791_v39 = vpop.xlane.xlu0 %790 }
 0x2ab   : > { %1267 = vrcp.f32 %v793_v19  ;;  %v819_v21 = vperm.slane %v818_v20, 0  ;;  %v805_v27 = vand.u32 2147483648, %v793_v19  ;;  %v803_v29 = vand.u32 2147483647, %v793_v19 }
 0x2ac   : > { %vm799_vm13 = vweird.f32 %v793_v19 }
 0x2ad   : > { %1269 = vrcp.f32 %v819_v21  ;;  %v831_v31 = vand.u32 2147483648, %v819_v21  ;;  %v829_v34 = vand.u32 2147483647, %v819_v21  ;;  %v806_v35 = vor.u32 1.1754944e-38, %v805_v27 }
 0x2ae   : > { %vm804_vm0 = vcmp.eq.f32.partialorder %v803_v29, 8.507059e+37  ;;  %vm825_vm1 = vweird.f32 %v819_v21 }
 0x2af   : > { %v832_v40 = vor.u32 1.1754944e-38, %v831_v31  ;;  %vm830_vm3 = vcmp.eq.f32.partialorder %v829_v34, 8.507059e+37 }
 0x2b0   : > { %v814_v44 = vpop.xlane.xlu2 %813 }
 0x2b1   : > { %v1268_v22 = vpop.eup %1267 }
 0x2b2   : > { %v795_v23 = vmul.f32 %v1268_v22, %v793_v19  ;;  %vm800_vm12 = vweird.f32 %v1268_v22 }
 0x2b3   : > { %v1270_v24 = vpop.eup %1269  ;;  %vm801_vm15 = vmor %vm799_vm13, %vm800_vm12 }
 0x2b4   : > { %v796_v25 = vsub.f32 1.0, %v795_v23  ;;  %v821_v26 = vmul.f32 %v1270_v24, %v819_v21  ;;  %vm826_vm14 = vweird.f32 %v1270_v24 }
 0x2b5   : > { %vm827_vm2 = vmor %vm825_vm1, %vm826_vm14 }
 0x2b6   : > { %v797_v28 = vmul.f32 %v1268_v22, %v796_v25  ;;  %v822_v30 = vsub.f32 1.0, %v821_v26 }
 0x2b8   : > { %v798_v32 = vadd.f32 %v1268_v22, %v797_v28  ;;  %v823_v33 = vmul.f32 %v1270_v24, %v822_v30 }
 0x2ba   : > { %v802_v36 = vsel %vm801_vm15, %v1268_v22, %v798_v32  ;;  %v824_v37 = vadd.f32 %v1270_v24, %v823_v33 }
 0x2bb   : > { %v807_v38 = vsel %vm804_vm0, %v806_v35, %v802_v36 }
 0x2bc   : > { %v808_v41 = vmul.f32 %v807_v38, %v791_v39  ;;  %v828_v42 = vsel %vm827_vm2, %v1270_v24, %v824_v37 }
 0x2bd   : > { %v833_v43 = vsel %vm830_vm3, %v832_v40, %v828_v42 }
 0x2be   : > { %809 = vst.msk [vmem:[%s385_s0] sm:$0xff] %vm415_vm4, %v808_v41  ;;  %v834_v45 = vmul.f32 %v833_v43, %v814_v44 }
 0x2c0   : > { %835 = vst.msk [vmem:[%s393_s28] sm:$0xff] %vm415_vm4, %v834_v45 }
 0x2c1 PF: > { %p1192_p3 = scmp.ge.s32.totalorder %s1397_s16, 2  ;;  %s906_s20 = sand.u32 1, %s1369_s30  }
 0x2c2   : > { %s907_s29 = scalar_lea.sflag [#allocation3], %s906_s20 }
 0x2c3   : > { %p1186_p4 = pnand %p1192_p3, %p1512_p8 }
 0x2c5   : > { %p1187_p5 = pneg %p1186_p4 }
 0x2c7   : > { %1360 = dma.done.wait (%p1187_p5), %s907_s29, 128  }
 0x2c8   : > { %1362 = vsyncadd (%p1187_p5), %s907_s29, 4294967168  ;;  %s917_s21 = scalar_lea.sflag [#allocation5], %s906_s20 }
 0x2c9   : > { %1364 = dma.done.wait (%p1187_p5), %s917_s21, 16  }
 0x2ca   : > { %1366 = vsyncadd (%p1187_p5), %s917_s21, 4294967280  ;;  %s26_s16 = sadd.s32 1, %s1397_s16   ;;  %s1740_s13 = sld [smem:[#allocation8_spill]] }
 0x2cb   : > { %p23_p6 = scmp.ge.s32.totalorder %s26_s16, 6   ;;  %s1741_s4 = sld [smem:[#allocation9_spill]] }
 0x2cc   : > { %s1742_s15 = sld [smem:[#allocation10_spill]]  ;;  %s1743_s30 = smov %s1373_s10 }
 0x2cd   : > { %s1744_s10 = smov %s1377_s11  ;;  %s1745_s11 = smov %s1521_s27 }
 0x2ce   : > { %s1746_s12 = smov %s1389_s14  ;;  %25 = sbr.rel (!%p23_p6) target bundleno = 14 (0xe), region = 122 }
 0x2d1   : > { %s1747_s14 = smov %s1741_s4 }
 0x2d3   :  { %944 = vsyncpa [#allocation3], 1 }
 0x2d4   :  { %946 = vsyncpa [#allocation3 + $0x1], 1 }
 0x2d5   :  { %947 = vsyncpa [#allocation5], 1 }
 0x2d6   :  { %949 = vsyncpa [#allocation5 + $0x1], 1 }

</bundles_post_ra>
